<compile_context>
chip_gen: v5e
topology: v5e:2x2
jax: 0.10.0
libtpu: 0.0.40
codegen_flags: <defaults>
</compile_context>

<pallas_src>
import jax
import jax.numpy as jnp
from jax.experimental import pallas as pl
from jax.experimental.pallas import tpu as pltpu


# ---------------------------------------------------------------------------
# helpers (plain JAX glue)
# ---------------------------------------------------------------------------
def interp_matrix(n_out, n_in):
    """1-D bilinear resize matrix, align_corners=True (matches F.interpolate)."""
    src = jnp.arange(n_out, dtype=jnp.float32) * (float(n_in - 1) / float(max(n_out - 1, 1)))
    i0 = jnp.clip(jnp.floor(src).astype(jnp.int32), 0, n_in - 1)
    i1 = jnp.minimum(i0 + 1, n_in - 1)
    frac = src - i0.astype(jnp.float32)
    return ((1.0 - frac)[:, None] * jax.nn.one_hot(i0, n_in, dtype=jnp.float32)
            + frac[:, None] * jax.nn.one_hot(i1, n_in, dtype=jnp.float32))


def fold_bn(bn, eps=1e-5):
    scale = bn["w"] / jnp.sqrt(bn["v"] + eps)
    shift = bn["b"] - bn["m"] * scale
    return scale, shift


# ---------------------------------------------------------------------------
# the fused Pallas kernel (one grid step = one batch element, layout = (C, N))
# ---------------------------------------------------------------------------
def _self_attn_kernel(x_ref, dn_ref, up_ref,
                      w1_ref, t1_ref,
                      wqkv_ref, bqkv_ref,
                      s2_ref, t2_ref,
                      w2_ref, t3_ref,
                      o_ref):
    f32, bf16 = jnp.float32, jnp.bfloat16
    x = x_ref[0]                                                       # (C_in, N_in) f32

    # bilinear downsample (align_corners=True) as a spatial matmul; lanes = N
    x_dn = jnp.dot(x.astype(bf16), dn_ref[...],
                   preferred_element_type=f32)                         # (C_in, N_dn)

    # net[0:3]: 1x1 conv (BN1 scale folded into the weight) -> shift -> ReLU
    h = jnp.dot(w1_ref[...], x_dn.astype(bf16), preferred_element_type=f32)
    h = jnp.maximum(h + t1_ref[...], 0.0)                              # (C, N_dn)

    # net[3]: ATT — fused q|k|v projection (gamma folded into the v rows, biases folded)
    qkv = jnp.dot(wqkv_ref[...], h.astype(bf16),
                  preferred_element_type=f32) + bqkv_ref[...]          # (16 + C, N_dn)
    q8 = qkv[0:8]        # (8, N_dn)  rows c8..7 are zero padding
    k8 = qkv[8:16]       # (8, N_dn)  rows c8..7 are zero padding
    v = qkv[16:]         # (C, N_dn)  already scaled by gamma

    # energy[n, m] = sum_c q[c, n] * k[c, m]   (tiny contraction, keep f32)
    e = jnp.dot(q8.T, k8, preferred_element_type=f32)                  # (N_dn, N_dn)
    e = e - jnp.max(e, axis=-1, keepdims=True)
    p = jnp.exp(e)
    a = p * pl.reciprocal(jnp.sum(p, axis=-1, keepdims=True), approx=True)

    # out[c, n] = sum_m v[c, m] * a[n, m]  (rhs-contracted dot_general, no transpose)
    att = jax.lax.dot_general(v.astype(bf16), a.astype(bf16),
                              (((1,), (1,)), ((), ())),
                              preferred_element_type=f32)              # (C, N_dn)
    h2 = att + h                                                       # gamma*out + x

    # net[5:9]: BN -> ReLU -> 1x1 conv (BN3 scale folded) -> shift
    u = jnp.maximum(h2 * s2_ref[...] + t2_ref[...], 0.0)
    y = jnp.dot(w2_ref[...], u.astype(bf16),
                preferred_element_type=f32) + t3_ref[...]              # (C_out, N_dn)

    # bilinear upsample back + residual (Identity shortcut) + ReLU — lane-dense store
    y_up = jnp.dot(y.astype(bf16), up_ref[...], preferred_element_type=f32)  # (C_out, N_in)
    o_ref[0] = jnp.maximum(y_up + x, 0.0)


def self_attn_forward(x_nchw, params):
    B, C_in, H, W = x_nchw.shape
    C = params["w1"].shape[0]       # attn_dim_in == attn_dim_out == dim_out
    c8 = params["wq"].shape[0]
    Hd, Wd = H // 2, W // 2
    N_in, N_dn = H * W, Hd * Wd

    f32, bf16 = jnp.float32, jnp.bfloat16
    x_cn = x_nchw.reshape(B, C_in, N_in)                 # matches torch .view(B, C, H*W)

    # spatial resize operators, applied from the right in (C, N) layout
    Dn = jnp.kron(interp_matrix(Hd, H), interp_matrix(Wd, W)).T      # (N_in, N_dn) down
    Up = jnp.kron(interp_matrix(H, Hd), interp_matrix(W, Wd)).T      # (N_dn, N_in) up

    s1, t1 = fold_bn(params["bn1"])
    s2, t2 = fold_bn(params["bn2"])
    s3, t3 = fold_bn(params["bn3"])

    w1f = params["w1"] * s1[:, None]          # BN1 scale folded into conv1 weight
    w2f = params["w2"] * s3[:, None]          # BN3 scale folded into conv2 weight
    gamma = params["gamma"][0]

    # fused q|k|v weight; q/k segments padded to 8 sublanes (zeros), gamma folded into v
    pad = 8 - c8
    wqkv = jnp.concatenate([
        params["wq"], jnp.zeros((pad, C), f32),
        params["wk"], jnp.zeros((pad, C), f32),
        gamma * params["wv"],
    ], axis=0)                                           # (16 + C, C)
    bqkv = jnp.concatenate([
        params["bq"], jnp.zeros((pad,), f32),
        params["bk"], jnp.zeros((pad,), f32),
        gamma * params["bv"],
    ], axis=0)[:, None]                                  # (16 + C, 1)

    args = (
        x_cn,
        Dn.astype(bf16), Up.astype(bf16),
        w1f.astype(bf16), t1[:, None],
        wqkv.astype(bf16), bqkv,
        s2[:, None], t2[:, None],
        w2f.astype(bf16), t3[:, None],
    )

    def const_spec(a):
        zeros = (0,) * a.ndim
        return pl.BlockSpec(a.shape, lambda b: zeros)

    in_specs = [pl.BlockSpec((1, C_in, N_in), lambda b: (b, 0, 0))] \
        + [const_spec(a) for a in args[1:]]

    # grid=(B,) parallel: both TensorCores busy on dual-TC chips for even B; per-step
    # overhead is negligible here.  (On single-TC v5e/v6e one could fold B into one step.)
    out_cn = pl.pallas_call(
        _self_attn_kernel,
        out_shape=jax.ShapeDtypeStruct((B, C, N_in), f32),
        grid_spec=pltpu.PrefetchScalarGridSpec(
            num_scalar_prefetch=0,
            grid=(B,),
            in_specs=in_specs,
            out_specs=pl.BlockSpec((1, C, N_in), lambda b: (b, 0, 0)),
        ),
        compiler_params=pltpu.CompilerParams(dimension_semantics=("parallel",)),
    )(*args)

    return out_cn.reshape(B, C, H, W)


# ---------------------------------------------------------------------------
# deterministic parameter construction (shapes from Self_Attn.__init__ / ATT.__init__)
# ---------------------------------------------------------------------------
def make_params(key, dim, dim_out):
    C = dim_out                 # proj_factor is forced to 1 in __init__
    c8 = C // 8
    ks = jax.random.split(key, 12)

    def conv_w(k, co, ci):
        return jax.random.normal(k, (co, ci), jnp.float32) / jnp.sqrt(float(ci))

    def bn_p(k, c):
        k1, k2, k3, k4 = jax.random.split(k, 4)
        return dict(w=1.0 + 0.1 * jax.random.normal(k1, (c,), jnp.float32),
                    b=0.1 * jax.random.normal(k2, (c,), jnp.float32),
                    m=0.1 * jax.random.normal(k3, (c,), jnp.float32),
                    v=0.5 + jax.random.uniform(k4, (c,), jnp.float32))

    return dict(
        w1=conv_w(ks[0], C, dim), bn1=bn_p(ks[1], C),
        wq=conv_w(ks[2], c8, C), bq=0.1 * jax.random.normal(ks[3], (c8,), jnp.float32),
        wk=conv_w(ks[4], c8, C), bk=0.1 * jax.random.normal(ks[5], (c8,), jnp.float32),
        wv=conv_w(ks[6], C, C), bv=0.1 * jax.random.normal(ks[7], (C,), jnp.float32),
        gamma=jnp.array([0.5], jnp.float32),   # torch inits zeros(1); nonzero for a non-degenerate test
        bn2=bn_p(ks[8], C),
        w2=conv_w(ks[9], dim_out, C),          # torch zero-inits this; nonzero for a non-degenerate test
        bn3=bn_p(ks[10], dim_out),
    )


# ---------------------------------------------------------------------------
# pure-JAX high-precision reference written in NCHW following the PyTorch code
# ---------------------------------------------------------------------------
def reference_forward(x, p):
    P = jax.lax.Precision.HIGHEST

    def conv1x1(t, w, b=None):
        y = jnp.einsum("oc,bchw->bohw", w, t, precision=P)
        return y if b is None else y + b[None, :, None, None]

    def bn(t, bnp, eps=1e-5):
        w, b, m, v = bnp["w"], bnp["b"], bnp["m"], bnp["v"]
        return ((t - m[None, :, None, None]) / jnp.sqrt(v[None, :, None, None] + eps)
                * w[None, :, None, None] + b[None, :, None, None])

    def bilinear(t, size):
        Ry = interp_matrix(size[0], t.shape[2])
        Rx = interp_matrix(size[1], t.shape[3])
        return jnp.einsum("ph,qw,bchw->bcpq", Ry, Rx, t, precision=P)

    relu = lambda t: jnp.maximum(t, 0.0)

    shortcut = x                                               # dim == dim_out, downsample=False
    out = bilinear(x, (x.shape[2] // 2, x.shape[3] // 2))
    out = relu(bn(conv1x1(out, p["w1"]), p["bn1"]))

    Bsz, C, d2, d3 = out.shape
    N = d2 * d3
    q = conv1x1(out, p["wq"], p["bq"]).reshape(Bsz, -1, N).transpose(0, 2, 1)
    k = conv1x1(out, p["wk"], p["bk"]).reshape(Bsz, -1, N)
    v = conv1x1(out, p["wv"], p["bv"]).reshape(Bsz, -1, N)
    energy = jnp.einsum("bnc,bcm->bnm", q, k, precision=P)
    attn = jax.nn.softmax(energy, axis=-1)
    o = jnp.einsum("bcm,bnm->bcn", v, attn, precision=P).reshape(Bsz, C, d2, d3)
    out = p["gamma"][0] * o + out

    out = relu(bn(out, p["bn2"]))
    out = bn(conv1x1(out, p["w2"]), p["bn3"])
    out = bilinear(out, (x.shape[2], x.shape[3]))
    out = out + shortcut
    return relu(out)


if __name__ == "__main__":
    key = jax.random.PRNGKey(0)
    kx, kp = jax.random.split(key)

    B, dim, H, W = 2, 32, 16, 16
    dim_out = 32                       # dim == dim_out, downsample=False -> Identity shortcut, stride 1
    x = jax.random.normal(kx, (B, dim, H, W), jnp.float32)
    params = make_params(kp, dim, dim_out)

    out = self_attn_forward(x, params)
    out = jax.block_until_ready(out)

    ref = reference_forward(x, params)
    assert out.shape == (B, dim_out, H, W), out.shape
    # kernel matmuls run with bf16 operands (f32 accumulation); compare against the
    # HIGHEST-precision reference with a tolerance sized for bf16 operand rounding.
    max_err = float(jnp.max(jnp.abs(out - ref)))
    ref_max = float(jnp.max(jnp.abs(ref)))
    assert max_err <= 1e-1 * max(ref_max, 1.0), f"max abs err {max_err} (ref max {ref_max})"
    print("KERNEL_OK")
</pallas_src>

<mosaic_0001>
module attributes {stable_mosaic.version = 11 : i64} {
  func.func @_self_attn_kernel(%arg0: i32, %arg1: memref<1x32x256xf32, #tpu.memory_space<vmem>>, %arg2: memref<256x64xbf16, #tpu.memory_space<vmem>>, %arg3: memref<64x256xbf16, #tpu.memory_space<vmem>>, %arg4: memref<32x32xbf16, #tpu.memory_space<vmem>>, %arg5: memref<32x1xf32, #tpu.memory_space<vmem>>, %arg6: memref<48x32xbf16, #tpu.memory_space<vmem>>, %arg7: memref<48x1xf32, #tpu.memory_space<vmem>>, %arg8: memref<32x1xf32, #tpu.memory_space<vmem>>, %arg9: memref<32x1xf32, #tpu.memory_space<vmem>>, %arg10: memref<32x32xbf16, #tpu.memory_space<vmem>>, %arg11: memref<32x1xf32, #tpu.memory_space<vmem>>, %arg12: memref<1x32x256xf32, #tpu.memory_space<vmem>>) attributes {dimension_semantics = [#tpu.dimension_semantics<parallel>], iteration_bounds = array<i64: 2>, scalar_prefetch = 0 : i64, scratch_operands = 0 : i64, tpu.core_type = #tpu.core_type<tc>, window_params = [{transform_indices = @transform_0, window_bounds = array<i64: 1, 32, 256>}, {pipeline_mode = #tpu.pipeline_mode<synchronous>, transform_indices = @transform_1, window_bounds = array<i64: 256, 64>}, {pipeline_mode = #tpu.pipeline_mode<synchronous>, transform_indices = @transform_2, window_bounds = array<i64: 64, 256>}, {pipeline_mode = #tpu.pipeline_mode<synchronous>, transform_indices = @transform_3, window_bounds = array<i64: 32, 32>}, {pipeline_mode = #tpu.pipeline_mode<synchronous>, transform_indices = @transform_4, window_bounds = array<i64: 32, 1>}, {pipeline_mode = #tpu.pipeline_mode<synchronous>, transform_indices = @transform_5, window_bounds = array<i64: 48, 32>}, {pipeline_mode = #tpu.pipeline_mode<synchronous>, transform_indices = @transform_6, window_bounds = array<i64: 48, 1>}, {pipeline_mode = #tpu.pipeline_mode<synchronous>, transform_indices = @transform_7, window_bounds = array<i64: 32, 1>}, {pipeline_mode = #tpu.pipeline_mode<synchronous>, transform_indices = @transform_8, window_bounds = array<i64: 32, 1>}, {pipeline_mode = #tpu.pipeline_mode<synchronous>, transform_indices = @transform_9, window_bounds = array<i64: 32, 32>}, {pipeline_mode = #tpu.pipeline_mode<synchronous>, transform_indices = @transform_10, window_bounds = array<i64: 32, 1>}, {transform_indices = @transform_11, window_bounds = array<i64: 1, 32, 256>}]} {
    %c0 = arith.constant 0 : index
    %c0_0 = arith.constant 0 : index
    %c0_1 = arith.constant 0 : index
    %0 = vector.load %arg1[%c0, %c0_0, %c0_1] : memref<1x32x256xf32, #tpu.memory_space<vmem>>, vector<1x32x256xf32>
    %1 = vector.shape_cast %0 : vector<1x32x256xf32> to vector<32x256xf32>
    %2 = arith.truncf %1 : vector<32x256xf32> to vector<32x256xbf16>
    %c0_2 = arith.constant 0 : index
    %c0_3 = arith.constant 0 : index
    %3 = vector.load %arg2[%c0_2, %c0_3] : memref<256x64xbf16, #tpu.memory_space<vmem>>, vector<256x64xbf16>
    %cst = arith.constant dense<0.000000e+00> : vector<32x64xf32>
    %4 = tpu.matmul %2, %3, %cst {dimension_numbers = #tpu.dot_dimension_numbers<[1], [0], [0], [1], [0, 0, 1, 1], [], []>} : vector<32x256xbf16>, vector<256x64xbf16>, vector<32x64xf32> -> vector<32x64xf32>
    %c0_4 = arith.constant 0 : index
    %c0_5 = arith.constant 0 : index
    %5 = vector.load %arg4[%c0_4, %c0_5] : memref<32x32xbf16, #tpu.memory_space<vmem>>, vector<32x32xbf16>
    %6 = arith.truncf %4 : vector<32x64xf32> to vector<32x64xbf16>
    %cst_6 = arith.constant dense<0.000000e+00> : vector<32x64xf32>
    %7 = tpu.matmul %5, %6, %cst_6 {dimension_numbers = #tpu.dot_dimension_numbers<[1], [0], [0], [1], [0, 0, 1, 1], [], []>} : vector<32x32xbf16>, vector<32x64xbf16>, vector<32x64xf32> -> vector<32x64xf32>
    %c0_7 = arith.constant 0 : index
    %c0_8 = arith.constant 0 : index
    %8 = vector.load %arg5[%c0_7, %c0_8] : memref<32x1xf32, #tpu.memory_space<vmem>>, vector<32x1xf32>
    %9 = vector.broadcast %8 : vector<32x1xf32> to vector<32x64xf32>
    %10 = arith.addf %7, %9 : vector<32x64xf32>
    %cst_9 = arith.constant 0.000000e+00 : f32
    %11 = vector.broadcast %cst_9 : f32 to vector<32x64xf32>
    %12 = arith.maximumf %10, %11 : vector<32x64xf32>
    %c0_10 = arith.constant 0 : index
    %c0_11 = arith.constant 0 : index
    %13 = vector.load %arg6[%c0_10, %c0_11] : memref<48x32xbf16, #tpu.memory_space<vmem>>, vector<48x32xbf16>
    %14 = arith.truncf %12 : vector<32x64xf32> to vector<32x64xbf16>
    %cst_12 = arith.constant dense<0.000000e+00> : vector<48x64xf32>
    %15 = tpu.matmul %13, %14, %cst_12 {dimension_numbers = #tpu.dot_dimension_numbers<[1], [0], [0], [1], [0, 0, 1, 1], [], []>} : vector<48x32xbf16>, vector<32x64xbf16>, vector<48x64xf32> -> vector<48x64xf32>
    %c0_13 = arith.constant 0 : index
    %c0_14 = arith.constant 0 : index
    %16 = vector.load %arg7[%c0_13, %c0_14] : memref<48x1xf32, #tpu.memory_space<vmem>>, vector<48x1xf32>
    %17 = vector.broadcast %16 : vector<48x1xf32> to vector<48x64xf32>
    %18 = arith.addf %15, %17 : vector<48x64xf32>
    %19 = vector.extract_strided_slice %18 {offsets = [0, 0], sizes = [8, 64], strides = [1, 1]} : vector<48x64xf32> to vector<8x64xf32>
    %20 = vector.extract_strided_slice %18 {offsets = [8, 0], sizes = [8, 64], strides = [1, 1]} : vector<48x64xf32> to vector<8x64xf32>
    %21 = vector.extract_strided_slice %18 {offsets = [16, 0], sizes = [32, 64], strides = [1, 1]} : vector<48x64xf32> to vector<32x64xf32>
    %22 = tpu.transpose %19, [1, 0] : vector<8x64xf32> -> vector<64x8xf32>
    %cst_15 = arith.constant dense<0.000000e+00> : vector<64x64xf32>
    %23 = tpu.matmul %22, %20, %cst_15 {dimension_numbers = #tpu.dot_dimension_numbers<[1], [0], [0], [1], [0, 0, 1, 1], [], []>} : vector<64x8xf32>, vector<8x64xf32>, vector<64x64xf32> -> vector<64x64xf32>
    %cst_16 = arith.constant dense<0xFF800000> : vector<64xf32>
    %24 = vector.multi_reduction <maximumf>, %23, %cst_16 [1] : vector<64x64xf32> to vector<64xf32>
    %25 = vector.shape_cast %24 : vector<64xf32> to vector<64x1xf32>
    %26 = vector.broadcast %25 : vector<64x1xf32> to vector<64x64xf32>
    %27 = arith.subf %23, %26 : vector<64x64xf32>
    %28 = math.exp %27 : vector<64x64xf32>
    %cst_17 = arith.constant dense<0.000000e+00> : vector<64xf32>
    %29 = vector.multi_reduction <add>, %28, %cst_17 [1] : vector<64x64xf32> to vector<64xf32>
    %30 = vector.shape_cast %29 : vector<64xf32> to vector<64x1xf32>
    %31 = tpu.reciprocal %30 {approx = true} : vector<64x1xf32> -> vector<64x1xf32>
    %32 = vector.broadcast %31 : vector<64x1xf32> to vector<64x64xf32>
    %33 = arith.mulf %28, %32 : vector<64x64xf32>
    %34 = arith.truncf %21 : vector<32x64xf32> to vector<32x64xbf16>
    %35 = arith.truncf %33 : vector<64x64xf32> to vector<64x64xbf16>
    %cst_18 = arith.constant dense<0.000000e+00> : vector<32x64xf32>
    %36 = tpu.matmul %34, %35, %cst_18 {dimension_numbers = #tpu.dot_dimension_numbers<[1], [1], [0], [0], [0, 0, 1, 0], [], []>} : vector<32x64xbf16>, vector<64x64xbf16>, vector<32x64xf32> -> vector<32x64xf32>
    %37 = arith.addf %36, %12 : vector<32x64xf32>
    %c0_19 = arith.constant 0 : index
    %c0_20 = arith.constant 0 : index
    %38 = vector.load %arg8[%c0_19, %c0_20] : memref<32x1xf32, #tpu.memory_space<vmem>>, vector<32x1xf32>
    %39 = vector.broadcast %38 : vector<32x1xf32> to vector<32x64xf32>
    %40 = arith.mulf %37, %39 : vector<32x64xf32>
    %c0_21 = arith.constant 0 : index
    %c0_22 = arith.constant 0 : index
    %41 = vector.load %arg9[%c0_21, %c0_22] : memref<32x1xf32, #tpu.memory_space<vmem>>, vector<32x1xf32>
    %42 = vector.broadcast %41 : vector<32x1xf32> to vector<32x64xf32>
    %43 = arith.addf %40, %42 : vector<32x64xf32>
    %cst_23 = arith.constant 0.000000e+00 : f32
    %44 = vector.broadcast %cst_23 : f32 to vector<32x64xf32>
    %45 = arith.maximumf %43, %44 : vector<32x64xf32>
    %c0_24 = arith.constant 0 : index
    %c0_25 = arith.constant 0 : index
    %46 = vector.load %arg10[%c0_24, %c0_25] : memref<32x32xbf16, #tpu.memory_space<vmem>>, vector<32x32xbf16>
    %47 = arith.truncf %45 : vector<32x64xf32> to vector<32x64xbf16>
    %cst_26 = arith.constant dense<0.000000e+00> : vector<32x64xf32>
    %48 = tpu.matmul %46, %47, %cst_26 {dimension_numbers = #tpu.dot_dimension_numbers<[1], [0], [0], [1], [0, 0, 1, 1], [], []>} : vector<32x32xbf16>, vector<32x64xbf16>, vector<32x64xf32> -> vector<32x64xf32>
    %c0_27 = arith.constant 0 : index
    %c0_28 = arith.constant 0 : index
    %49 = vector.load %arg11[%c0_27, %c0_28] : memref<32x1xf32, #tpu.memory_space<vmem>>, vector<32x1xf32>
    %50 = vector.broadcast %49 : vector<32x1xf32> to vector<32x64xf32>
    %51 = arith.addf %48, %50 : vector<32x64xf32>
    %52 = arith.truncf %51 : vector<32x64xf32> to vector<32x64xbf16>
    %c0_29 = arith.constant 0 : index
    %c0_30 = arith.constant 0 : index
    %53 = vector.load %arg3[%c0_29, %c0_30] : memref<64x256xbf16, #tpu.memory_space<vmem>>, vector<64x256xbf16>
    %cst_31 = arith.constant dense<0.000000e+00> : vector<32x256xf32>
    %54 = tpu.matmul %52, %53, %cst_31 {dimension_numbers = #tpu.dot_dimension_numbers<[1], [0], [0], [1], [0, 0, 1, 1], [], []>} : vector<32x64xbf16>, vector<64x256xbf16>, vector<32x256xf32> -> vector<32x256xf32>
    %55 = arith.addf %54, %1 : vector<32x256xf32>
    %cst_32 = arith.constant 0.000000e+00 : f32
    %56 = vector.broadcast %cst_32 : f32 to vector<32x256xf32>
    %57 = arith.maximumf %55, %56 : vector<32x256xf32>
    %c0_33 = arith.constant 0 : index
    %c0_34 = arith.constant 0 : index
    %c0_35 = arith.constant 0 : index
    %58 = vector.load %arg12[%c0_33, %c0_34, %c0_35] : memref<1x32x256xf32, #tpu.memory_space<vmem>>, vector<1x32x256xf32>
    %59 = vector.shape_cast %58 : vector<1x32x256xf32> to vector<32x256xf32>
    %60 = vector.shape_cast %57 : vector<32x256xf32> to vector<1x32x256xf32>
    tpu.vector_store %arg12[%c0_33, %c0_34, %c0_35], %60 {strides = array<i32>} : memref<1x32x256xf32, #tpu.memory_space<vmem>>, vector<1x32x256xf32>,
    return
  }
  func.func @transform_0(%arg0: i32) -> (i32, i32, i32) {
    %c0_i32 = arith.constant 0 : i32
    %c0_i32_0 = arith.constant 0 : i32
    %c0_i32_1 = arith.constant 0 : i32
    return %arg0, %c0_i32, %c0_i32_0 : i32, i32, i32
  }
  func.func @transform_1(%arg0: i32) -> (i32, i32) {
    %c0_i32 = arith.constant 0 : i32
    %c0_i32_0 = arith.constant 0 : i32
    %c0_i32_1 = arith.constant 0 : i32
    return %c0_i32, %c0_i32_0 : i32, i32
  }
  func.func @transform_2(%arg0: i32) -> (i32, i32) {
    %c0_i32 = arith.constant 0 : i32
    %c0_i32_0 = arith.constant 0 : i32
    %c0_i32_1 = arith.constant 0 : i32
    return %c0_i32, %c0_i32_0 : i32, i32
  }
  func.func @transform_3(%arg0: i32) -> (i32, i32) {
    %c0_i32 = arith.constant 0 : i32
    %c0_i32_0 = arith.constant 0 : i32
    %c0_i32_1 = arith.constant 0 : i32
    return %c0_i32, %c0_i32_0 : i32, i32
  }
  func.func @transform_4(%arg0: i32) -> (i32, i32) {
    %c0_i32 = arith.constant 0 : i32
    %c0_i32_0 = arith.constant 0 : i32
    %c0_i32_1 = arith.constant 0 : i32
    return %c0_i32, %c0_i32_0 : i32, i32
  }
  func.func @transform_5(%arg0: i32) -> (i32, i32) {
    %c0_i32 = arith.constant 0 : i32
    %c0_i32_0 = arith.constant 0 : i32
    %c0_i32_1 = arith.constant 0 : i32
    return %c0_i32, %c0_i32_0 : i32, i32
  }
  func.func @transform_6(%arg0: i32) -> (i32, i32) {
    %c0_i32 = arith.constant 0 : i32
    %c0_i32_0 = arith.constant 0 : i32
    %c0_i32_1 = arith.constant 0 : i32
    return %c0_i32, %c0_i32_0 : i32, i32
  }
  func.func @transform_7(%arg0: i32) -> (i32, i32) {
    %c0_i32 = arith.constant 0 : i32
    %c0_i32_0 = arith.constant 0 : i32
    %c0_i32_1 = arith.constant 0 : i32
    return %c0_i32, %c0_i32_0 : i32, i32
  }
  func.func @transform_8(%arg0: i32) -> (i32, i32) {
    %c0_i32 = arith.constant 0 : i32
    %c0_i32_0 = arith.constant 0 : i32
    %c0_i32_1 = arith.constant 0 : i32
    return %c0_i32, %c0_i32_0 : i32, i32
  }
  func.func @transform_9(%arg0: i32) -> (i32, i32) {
    %c0_i32 = arith.constant 0 : i32
    %c0_i32_0 = arith.constant 0 : i32
    %c0_i32_1 = arith.constant 0 : i32
    return %c0_i32, %c0_i32_0 : i32, i32
  }
  func.func @transform_10(%arg0: i32) -> (i32, i32) {
    %c0_i32 = arith.constant 0 : i32
    %c0_i32_0 = arith.constant 0 : i32
    %c0_i32_1 = arith.constant 0 : i32
    return %c0_i32, %c0_i32_0 : i32, i32
  }
  func.func @transform_11(%arg0: i32) -> (i32, i32, i32) {
    %c0_i32 = arith.constant 0 : i32
    %c0_i32_0 = arith.constant 0 : i32
    %c0_i32_1 = arith.constant 0 : i32
    return %arg0, %c0_i32, %c0_i32_0 : i32, i32, i32
  }
}

</mosaic_0001>

<bundles_post_ra>
// kernel: tpu_custom_call.1
= control target key start
LH: loop header
LB: loop body
LE: loop exit
PB: predicated region body
PF: predicated region fallthrough
CT: control target
= control target key end

     0   :  { %16 = vsyncpa [#allocation3], 0  ;;  %s2074_s0 = inlined_call_operand.vmem [shape: f32[2,32,256], index: 0, kind: input, shape index: {}]   ;;  %s2075_s1 = inlined_call_operand.vmem [shape: bf16[256,64], index: 1, kind: input, shape index: {}]   ;;  %s2076_s2 = inlined_call_operand.vmem [shape: bf16[64,256], index: 2, kind: input, shape index: {}]   ;;  %s2077_s3 = inlined_call_operand.vmem [shape: bf16[32,32], index: 3, kind: input, shape index: {}]   ;;  %s2078_s4 = inlined_call_operand.vmem [shape: f32[32,1], index: 4, kind: input, shape index: {}]   ;;  %s2079_s5 = inlined_call_operand.vmem [shape: bf16[48,32], index: 5, kind: input, shape index: {}]   ;;  %s2080_s6 = inlined_call_operand.vmem [shape: f32[48,1], index: 6, kind: input, shape index: {}]   ;;  %s2081_s7 = inlined_call_operand.vmem [shape: f32[32,1], index: 7, kind: input, shape index: {}]   ;;  %s2082_s8 = inlined_call_operand.vmem [shape: f32[32,1], index: 8, kind: input, shape index: {}]   ;;  %s2083_s9 = inlined_call_operand.vmem [shape: bf16[32,32], index: 9, kind: input, shape index: {}]   ;;  %s2084_s10 = inlined_call_operand.vmem [shape: f32[32,1], index: 10, kind: input, shape index: {}]   ;;  %s2085_s11 = inlined_call_operand.hbm [shape: f32[2,32,256], index: 11, kind: output, shape index: {}]  }
   0x1   :  { %18 = vsyncpa [#allocation3 + $0x1], 0  ;;  %s1666_s17 = smov 0   ;;  %s1668_s18 = smov 0  }
   0x2   :  { %s1670_s19 = smov 0   ;;  %s1672_s20 = smov 0  }
   0x3 LB: > { %2089 = sst [smem:[#allocation5_spill]] %s1597_s19  ;;  %s1687_s21 = sadd.s32 4294967295, %s1601_s20   ;;  %s1601_s20 = sphi %s1672_s20, %s2094_s20   ;;  %s1597_s19 = sphi %s1670_s19, %s2096_s19   ;;  %s1593_s18 = sphi %s1668_s18, %s2098_s18   ;;  %s1589_s17 = sphi %s1666_s17, %s2097_s17  }
   0x4   : > { %s1269_s22 = sadd.s32 4294967294, %s1601_s20   ;;  %s1691_s23 = sadd.s32 1, %s1601_s20  }
   0x5   : > { %2090 = sst [smem:[#allocation6_spill]] %s1691_s23  ;;  %s267_s24 = sadd.s32 1, %s1597_s19 }
   0x6   : > { %s264_s25 = ssub.s32 %s1601_s20, %s1691_s23  ;;  %p277_p0 = scmp.ne.s32.totalorder %s1597_s19, %s1593_s18 }
   0x7   : > { %p265_p1 = scmp.eq.s32.totalorder %s264_s25, 0  ;;  %p278_p2 = scmp.eq.s32.totalorder %s1687_s21, 1 }
   0x8   : > { %p283_p3 = scmp.ne.s32.totalorder %s1593_s18, %s1589_s17  ;;  %p284_p4 = scmp.eq.s32.totalorder %s1269_s22, 1 }
   0x9   : > { %s1702_s26 = scalar_select %p265_p1, %s1597_s19, %s267_s24  }
   0xa   : > { %p1704_p5 = por %p278_p2, %p277_p0  ;;  %p1708_p6 = por %p284_p4, %p283_p3 }
   0xb   : > { %2091 = sst [smem:[#allocation7_spill]] %s1702_s26  ;;  %p1272_p7 = scmp.ge.s32.totalorder %s1601_s20, 1 }
   0xc   : > { %p340_p8 = scmp.lt.s32.totalorder %s1601_s20, 3 }
   0xe   : > { %p341_p9 = pnand %p1272_p7, %p340_p8 }
   0xf   : > { %p380_p10 = scmp.lt.s32.totalorder (!%p341_p9), %s1687_s21, 1  ;;  %s1458_s26 = sshll.u32 (!%p341_p9), %s1687_s21, 6 }
  0x10   : > { %344 = sbr.rel (%p341_p9) target bundleno = 1676 (0x68c), region = 64  ;;  %s1203_s16 = scalar_lea.hbm (!%p341_p9), %s2085_s11, %s1458_s26 }
  0x11   : > { %s1206_s24 = sshll.u32 (!%p341_p9), %s1203_s16, 4  ;;  %s1207_s24 = int_to_ptr.hbm [resolvable:$true] %s1206_s24 }
  0x12   : > { %s1553_s25 = sshra.s32 (!%p341_p9), %s1207_s24, 4  ;;  %s1554_s25 = int_to_ptr.hbm [resolvable:$true] %s1553_s25 }
  0x13   : > { %p1560_p0 = scmp.lt.s32.totalorder (!%p341_p9), %s1554_s25, %s2085_s11 }
  0x15   : > { %v1434_v0 = vld [vmem:[%s2075_s1 + $0x38] sm:$0xff]  ;;  %v1433_v2 = vld [vmem:[%s2075_s1 + $0x30] sm:$0xff]  ;;  %v1432_v4 = vld [vmem:[%s2075_s1 + $0x28] sm:$0xff]  ;;  %s381_s29 = scalar_select %p380_p10, %s1687_s21, 1  ;;  %v1603_v30 = vmov 0   ;;  %vm604_vm0 = vcmask 261120  }
  0x16   : > { %v1442_v1 = vld [vmem:[%s2075_s1 + $0x78] sm:$0xff]  ;;  %526 = vmatpush.bf16.msra.mxu0 %v1434_v0  ;;  %v1441_v3 = vld [vmem:[%s2075_s1 + $0x70] sm:$0xff]  ;;  %v1440_v5 = vld [vmem:[%s2075_s1 + $0x68] sm:$0xff]  ;;  %1505 = vset.pattern.permute.xlu1 %v1603_v30  ;;  %vm758_vm1 = vcmask 64512   ;;  %vm824_vm2 = vcmask 523264  }
  0x17   : > { %545 = vmatpush.bf16.msra.mxu1 %v1442_v1  ;;  %v1431_v6 = vld [vmem:[%s2075_s1 + $0x20] sm:$0xff]  ;;  %v1430_v8 = vld [vmem:[%s2075_s1 + $0x18] sm:$0xff]  ;;  %v1429_v10 = vld [vmem:[%s2075_s1 + $0x10] sm:$0xff]  ;;  %s1426_s15 = sshll.u32 %s381_s29, 6  ;;  %1504 = vset.pattern.permute.xlu0 %v1603_v30  ;;  %s377_s29 = sand.u32 1, %s1593_s18  }
  0x18   : > { %v1439_v7 = vld [vmem:[%s2075_s1 + $0x60] sm:$0xff]  ;;  %v1438_v9 = vld [vmem:[%s2075_s1 + $0x58] sm:$0xff]  ;;  %v1437_v11 = vld [vmem:[%s2075_s1 + $0x50] sm:$0xff]  ;;  %s384_s30 = scalar_lea.vmem %s2074_s0, %s1426_s15  ;;  %1506 = vset.pattern.permute.xlu2 %v1603_v30  ;;  %s1273_s19 = sshll.u32 %s377_s29, 6 }
  0x19   : > { %v1428_v12 = vld [vmem:[%s2075_s1 + $0x8] sm:$0xff]  ;;  %v1427_v14 = vld [vmem:[%s2075_s1] sm:$0xff]  ;;  %v1769_v17 = vld [vmem:[%s384_s30 + $0x10] sm:$0xff]  ;;  %s2023_s23 = scalar_lea.vmem [#allocation2], %s1273_s19  ;;  %s1192_s21 = scalar_lea.sflag [#allocation3], %s377_s29 }
  0x1a   : > { %527 = vmatpush.bf16.msra.mxu0 %v1433_v2  ;;  %v1436_v13 = vld [vmem:[%s2075_s1 + $0x48] sm:$0xff]  ;;  %v1435_v15 = vld [vmem:[%s2075_s1 + $0x40] sm:$0xff]  ;;  %v1773_v19 = vld [vmem:[%s384_s30 + $0x18] sm:$0xff]  ;;  %s1204_s22 = sshll.u32 %s2023_s23, 4  ;;  %s1559_s19 = scalar_lea.hbm %s2085_s11, 128  ;;  %s1205_s22 = int_to_ptr.vmem [resolvable:$true] %s1204_s22 }
  0x1b   : > { %546 = vmatpush.bf16.msra.mxu1 %v1441_v3  ;;  %v1767_v16 = vld [vmem:[%s384_s30] sm:$0xff]  ;;  %v1771_v18 = vld [vmem:[%s384_s30 + $0x8] sm:$0xff]  ;;  %v1781_v23 = vld [vmem:[%s384_s30 + $0x30] sm:$0xff] }
  0x1c   : > { %v394_v20 = vpack.c.bf16 %v1769_v17, %v1767_v16  ;;  %v395_v21 = vpack.c.bf16 %v1773_v19, %v1771_v18  ;;  %v1779_v22 = vld [vmem:[%s384_s30 + $0x20] sm:$0xff]  ;;  %v1783_v24 = vld [vmem:[%s384_s30 + $0x28] sm:$0xff]  ;;  %v1785_v25 = vld [vmem:[%s384_s30 + $0x38] sm:$0xff]  ;;  %s1555_s30 = scalar_lea.hbm %s1554_s25, 64 }
  0x1d   : > { %v396_v26 = vpack.c.bf16 %v1781_v23, %v1779_v22  ;;  %v397_v27 = vpack.c.bf16 %v1785_v25, %v1783_v24  ;;  %v570_v35 = vld [vmem:[%s2078_s4] sm:$0xff]  ;;  %v572_v36 = vld [vmem:[%s2078_s4 + $0x10] sm:$0xff]  ;;  %v571_v41 = vld [vmem:[%s2078_s4 + $0x8] sm:$0xff]  ;;  %p1556_p11 = scmp.ne.s32.totalorder %s1554_s25, %s1555_s30  ;;  %p1561_p1 = scmp.lt.s32.totalorder %s1559_s19, %s1555_s30 }
  0x1e   : > { %528 = vmatpush.bf16.msra.mxu0 %v1432_v4  ;;  %576 = vperm.xlu1 %1505, %v570_v35   ;;  %v573_v44 = vld [vmem:[%s2078_s4 + $0x18] sm:$0xff]  ;;  %v1443_v47 = vld [vmem:[%s2077_s3] sm:$0xff]  ;;  %v1444_v48 = vld [vmem:[%s2077_s3 + $0x8] sm:$0xff] }
  0x1f   : > { %547 = vmatpush.bf16.msra.mxu1 %v1440_v5  ;;  %586 = vperm.xlu0 %1504, %v572_v36   ;;  %v642_v50 = vld [vmem:[%s2080_s6] sm:$0xff]  ;;  %v643_v53 = vld [vmem:[%s2080_s6 + $0x8] sm:$0xff]  ;;  %p1557_p12 = pnand %p1556_p11, %p1704_p5  ;;  %p1562_p2 = por %p1561_p1, %p1560_p0 }
  0x20   : > { %650 = vperm.xlu2 %1506, %v642_v50   ;;  %v1445_v5 = vld [vmem:[%s2079_s5] sm:$0xff] }
  0x21   : > { %p1558_p13 = pneg %p1557_p12 }
  0x22   : > { %529 = vmatpush.bf16.msra.mxu0 %v1431_v6 }
  0x23   : > { %548 = vmatpush.bf16.msra.mxu1 %v1439_v7  ;;  %p1563_p3 = pnand %p1562_p2, %p1558_p13 }
  0x26   : > { %530 = vmatpush.bf16.msra.mxu0 %v1430_v8  ;;  %581 = vperm.xlu1 %1505, %v571_v41  }
  0x27   : > { %549 = vmatpush.bf16.msra.mxu1 %v1438_v9  ;;  %591 = vperm.xlu0 %1504, %v573_v44  }
  0x28   : > { %655 = vperm.xlu2 %1506, %v643_v53   ;;  %v1447_v53 = vld [vmem:[%s2079_s5 + $0x10] sm:$0xff] }
  0x2a   : > { %531 = vmatpush.bf16.msra.mxu0 %v1429_v10 }
  0x2b   : > { %550 = vmatpush.bf16.msra.mxu1 %v1437_v11 }
  0x2e   : > { %532 = vmatpush.bf16.msra.mxu0 %v1428_v12 }
  0x2f   : > { %551 = vmatpush.bf16.msra.mxu1 %v1436_v13 }
  0x32   : > { %533 = vmatpush.bf16.msra.mxu0 %v1427_v14 }
  0x33   : > { %552 = vmatpush.bf16.msra.mxu1 %v1435_v15 }
  0x35   : > { %534 = vmatmul.bf16.vlgmr.msra.gmra.mxu0 %v394_v20 }
  0x36   : > { %553 = vmatmul.bf16.vlgmr.msra.gmra.mxu1 %v395_v21 }
  0x45   : > { %539 = vmatmul.bf16.gmra.mxu0 %v396_v26 }
  0x46   : > { %558 = vmatmul.bf16.gmra.mxu1 %v397_v27 }
  0x7a   : > { %v651_v6 = vpop.permute.xlu2 %650 }
  0x82   : > { %v656_v9 = vpop.permute.xlu2 %655 }
  0x90   : > { %v577_v52 = vpop.permute.xlu1 %576 }
  0x91   : > { %v587_v54 = vpop.permute.xlu0 %586 }
  0x98   : > { %v582_v56 = vpop.permute.xlu1 %581 }
  0x99   : > { %v592_v58 = vpop.permute.xlu0 %591 }
  0xb2   : > { %v535_v28 = vpop.f32.mrf.mxu0 }
  0xb3   : > { %v554_v29 = vpop.f32.mrf.mxu1 }
  0xb4   : > { %v555_v45 = vadd.f32 %v554_v29, %v535_v28 }
  0xba   : > { %v537_v31 = vpop.f32.mrf.mxu0 }
  0xbb   : > { %v556_v32 = vpop.f32.mrf.mxu1 }
  0xbc   : > { %v557_v42 = vadd.f32 %v556_v32, %v537_v31 }
  0xbe   : > { %v568_v46 = vpack.c.bf16 %v557_v42, %v555_v45  ;;  %v1446_v45 = vld [vmem:[%s2079_s5 + $0x8] sm:$0xff] }
  0xc2   : > { %v540_v33 = vpop.f32.mrf.mxu0 }
  0xc3   : > { %v559_v34 = vpop.f32.mrf.mxu1 }
  0xc4   : > { %v560_v39 = vadd.f32 %v559_v34, %v540_v33 }
  0xca   : > { %v542_v37 = vpop.f32.mrf.mxu0 }
  0xcb   : > { %v561_v38 = vpop.f32.mrf.mxu1 }
  0xcc   : > { %v562_v40 = vadd.f32 %v561_v38, %v542_v37 }
  0xce   : > { %v569_v43 = vpack.c.bf16 %v562_v40, %v560_v39 }
  0xd0   : > { %617 = vmatpush.bf16.msra.mxu2 %v569_v43 }
  0xd4   : > { %618 = vmatpush.bf16.msra.mxu2 %v568_v46 }
  0xd7   : > { %1348 = vmatmul.msk.bf16.vlgmr.msra.gmra.mxu2 %vm604_vm0, %v1443_v47 }
  0xe7   : > { %1349 = vmatmul.msk.bf16.gmra.mxu2 %vm604_vm0, %v1444_v48 }
 0x15a   : > { %v620_v49 = vpop.f32.mrf.mxu2 }
 0x15b   : > { %v1823_v62 = vadd.f32 %v620_v49, %v577_v52 }
 0x15d   : > { %v630_v3 = vmax.f32 %v1823_v62, 0.0 }
 0x162   : > { %v622_v51 = vpop.f32.mrf.mxu2 }
 0x163   : > { %v1819_v60 = vadd.f32 %v622_v51, %v582_v56 }
 0x165   : > { %v631_v1 = vmax.f32 %v1819_v60, 0.0  ;;  %v1456_v60 = vld [vmem:[%s2076_s2 + $0x34] sm:$0xf] }
 0x167   : > { %v640_v4 = vpack.c.bf16 %v631_v1, %v630_v3 }
 0x16a   : > { %v625_v55 = vpop.f32.mrf.mxu2 }
 0x16b   : > { %v1817_v57 = vadd.f32 %v625_v55, %v587_v54 }
 0x16d   : > { %v632_v63 = vmax.f32 %v1817_v57, 0.0  ;;  %v1457_v57 = vld [vmem:[%s2076_s2 + $0x34] sm:$0xf0] }
 0x172   : > { %v627_v59 = vpop.f32.mrf.mxu2 }
 0x173   : > { %v1821_v61 = vadd.f32 %v627_v59, %v592_v58 }
 0x175   : > { %v633_v0 = vmax.f32 %v1821_v61, 0.0  ;;  %v1413_v61 = vld [vmem:[%s2076_s2 + $0x38] sm:$0xf0] }
 0x177   : > { %v641_v2 = vpack.c.bf16 %v633_v0, %v632_v63 }
 0x179   : > { %708 = vmatpush.bf16.msrb.mxu0 %v641_v2  ;;  %1459 = vmatpush.bf16.msra.mxu3 %v641_v2 }
 0x17d   : > { %709 = vmatpush.bf16.msrb.mxu0 %v640_v4  ;;  %1460 = vmatpush.bf16.msra.mxu3 %v640_v4 }
 0x180   : > { %1362 = vmatmul.msk.bf16.vlgmr.msrb.gmra.mxu0 %vm604_vm0, %v1445_v5  ;;  %1363 = vmatmul.msk.bf16.vlgmr.msra.gmra.mxu3 %vm604_vm0, %v1446_v45  ;;  %v956_v45 = vld [vmem:[%s2081_s7] sm:$0xff] }
 0x190   : > { %1364 = vmatmul.msk.bf16.gmra.mxu3 %vm604_vm0, %v1447_v53  ;;  %v1025_v53 = vld [vmem:[%s2084_s10 + $0x18] sm:$0xff] }
 0x1fd   : > { %v711_v7 = vpop.f32.mrf.mxu0 }
 0x1fe   : > { %v712_v8 = vadd.f32 %v711_v7, %v651_v6 }
 0x200   : > { %726 = vxpose.xlu0.b32.start.end [1/1] (short) (narrow) %v712_v8, 64 }
 0x205   : > { %v713_v10 = vpop.f32.mrf.mxu0 }
 0x206   : > { %v714_v11 = vadd.f32 %v713_v10, %v656_v9 }
 0x208   : > { %798 = vmatpush.msrb.mxu2 %v714_v11 }
 0x2a4   : > { %v742_v12 = vpop.trf.xlu0 }
 0x2a5   : > { %1365 = vmatmul.msk.f32.vlgmr.msrb.gmra.mxu2 %vm758_vm1, %v742_v12 }
 0x2ac   : > { %v743_v13 = vpop.trf.xlu0 }
 0x2ad   : > { %1366 = vmatmul.msk.f32.gmra.mxu2 %vm758_vm1, %v743_v13 }
 0x2b4   : > { %v744_v14 = vpop.trf.xlu0 }
 0x2b5   : > { %1367 = vmatmul.msk.f32.gmra.mxu2 %vm758_vm1, %v744_v14 }
 0x2bc   : > { %v745_v15 = vpop.trf.xlu0 }
 0x2bd   : > { %1368 = vmatmul.msk.f32.gmra.mxu2 %vm758_vm1, %v745_v15 }
 0x2c4   : > { %v746_v20 = vpop.trf.xlu0 }
 0x2c5   : > { %1369 = vmatmul.msk.f32.gmra.mxu2 %vm758_vm1, %v746_v20 }
 0x2cc   : > { %v747_v21 = vpop.trf.xlu0 }
 0x2cd   : > { %1370 = vmatmul.msk.f32.gmra.mxu2 %vm758_vm1, %v747_v21 }
 0x2d4   : > { %v748_v26 = vpop.trf.xlu0 }
 0x2d5   : > { %1371 = vmatmul.msk.f32.gmra.mxu2 %vm758_vm1, %v748_v26 }
 0x2dc   : > { %v749_v27 = vpop.trf.xlu0 }
 0x2dd   : > { %1372 = vmatmul.msk.f32.gmra.mxu2 %vm758_vm1, %v749_v27 }
 0x328   : > { %v800_v28 = vpop.f32.mrf.mxu2 }
 0x329   : > { %v825_v40 = vsel %vm824_vm2, %v800_v28, -inf }
 0x330   : > { %v803_v29 = vpop.f32.mrf.mxu2 }
 0x331   : > { %v828_v43 = vsel %vm824_vm2, %v803_v29, -inf }
 0x338   : > { %v806_v30 = vpop.f32.mrf.mxu2 }
 0x339   : > { %v831_v38 = vsel %vm824_vm2, %v806_v30, -inf }
 0x340   : > { %v809_v31 = vpop.f32.mrf.mxu2 }
 0x341   : > { %v834_v42 = vsel %vm824_vm2, %v809_v31, -inf }
 0x348   : > { %v812_v32 = vpop.f32.mrf.mxu2 }
 0x349   : > { %v837_v33 = vsel %vm824_vm2, %v812_v32, -inf }
 0x34a   : > { %838 = vmax.xlane.f32.xlu0 %v837_v33 }
 0x350   : > { %v815_v34 = vpop.f32.mrf.mxu2 }
 0x351   : > { %v840_v41 = vsel %vm824_vm2, %v815_v34, -inf }
 0x358   : > { %v818_v35 = vpop.f32.mrf.mxu2 }
 0x359   : > { %v843_v36 = vsel %vm824_vm2, %v818_v35, -inf }
 0x35a   : > { %844 = vmax.xlane.f32.xlu1 %v843_v36 }
 0x360   : > { %v1851_v37 = vpop.f32.mrf.mxu2 }
 0x361   : > { %v846_v39 = vsel %vm824_vm2, %v1851_v37, -inf }
 0x362   : > { %832 = vmax.xlane.f32.xlu1 %v831_v38  ;;  %847 = vmax.xlane.f32.xlu2 %v846_v39  ;;  %v646_v39 = vld [vmem:[%s2080_s6 + $0x20] sm:$0xff] }
 0x36a   : > { %826 = vmax.xlane.f32.xlu1 %v825_v40  ;;  %841 = vmax.xlane.f32.xlu2 %v840_v41  ;;  %v645_v40 = vld [vmem:[%s2080_s6 + $0x18] sm:$0xff]  ;;  %v958_v41 = vld [vmem:[%s2081_s7 + $0x10] sm:$0xff] }
 0x372   : > { %835 = vmax.xlane.f32.xlu2 %v834_v42  ;;  %v647_v42 = vld [vmem:[%s2080_s6 + $0x28] sm:$0xff] }
 0x37a   : > { %829 = vmax.xlane.f32.xlu2 %v828_v43  ;;  %v986_v43 = vld [vmem:[%s2082_s8 + $0x10] sm:$0xff] }
 0x3bd   : > { %v839_v55 = vpop.xlane.xlu0 %838 }
 0x3be   : > { %v853_v59 = vsub.f32 %v812_v32, %v839_v55 }
 0x3c0   : > { %v865_v4 = vmul.f32 1.442695, %v853_v59 }
 0x3cd   : > { %v845_v44 = vpop.xlane.xlu1 %844 }
 0x3ce   : > { %v855_v8 = vsub.f32 %v818_v35, %v845_v44  ;;  %v959_v44 = vld [vmem:[%s2081_s7 + $0x18] sm:$0xff] }
 0x3d0   : > { %v869_v12 = vmul.f32 1.442695, %v855_v8 }
 0x3d5   : > { %v833_v46 = vpop.xlane.xlu1 %832  ;;  %v848_v47 = vpop.xlane.xlu2 %847 }
 0x3d6   : > { %v851_v51 = vsub.f32 %v806_v30, %v833_v46  ;;  %v856_v30 = vsub.f32 %v1851_v37, %v848_v47  ;;  %v644_v37 = vld [vmem:[%s2080_s6 + $0x10] sm:$0xff]  ;;  %v987_v46 = vld [vmem:[%s2082_s8 + $0x18] sm:$0xff]  ;;  %v984_v47 = vld [vmem:[%s2082_s8] sm:$0xff] }
 0x3d8   : > { %v861_v54 = vmul.f32 1.442695, %v851_v51  ;;  %v871_v33 = vmul.f32 1.442695, %v856_v30  ;;  %v1024_v51 = vld [vmem:[%s2084_s10 + $0x10] sm:$0xff] }
 0x3dd   : > { %v827_v48 = vpop.xlane.xlu1 %826  ;;  %v842_v49 = vpop.xlane.xlu2 %841 }
 0x3de   : > { %v849_v50 = vsub.f32 %v800_v28, %v827_v48  ;;  %v854_v20 = vsub.f32 %v815_v34, %v842_v49  ;;  %v957_v48 = vld [vmem:[%s2081_s7 + $0x8] sm:$0xff]  ;;  %v1022_v49 = vld [vmem:[%s2084_s10] sm:$0xff] }
 0x3e0   : > { %v857_v52 = vmul.f32 1.442695, %v849_v50  ;;  %v867_v27 = vmul.f32 1.442695, %v854_v20  ;;  %v985_v50 = vld [vmem:[%s2082_s8 + $0x8] sm:$0xff] }
 0x3e2   : > { %1507 = vpow2.f32 %v857_v52  ;;  %v1023_v52 = vld [vmem:[%s2084_s10 + $0x8] sm:$0xff] }
 0x3e3   : > { %1509 = vpow2.f32 %v861_v54 }
 0x3e4   : > { %1511 = vpow2.f32 %v865_v4 }
 0x3e5   : > { %v836_v56 = vpop.xlane.xlu2 %835 }
 0x3e6   : > { %v852_v9 = vsub.f32 %v809_v31, %v836_v56 }
 0x3e8   : > { %v1868_v58 = vpop.eup %1507  ;;  %v863_v13 = vmul.f32 1.442695, %v852_v9 }
 0x3e9   : > { %v873_v2 = vsel %vm824_vm2, %v1868_v58, 0.0  ;;  %v1872_v6 = vpop.eup %1509 }
 0x3ea   : > { %874 = vadd.xlane.f32.xlu1 %v873_v2  ;;  %v879_v11 = vsel %vm824_vm2, %v1872_v6, 0.0  ;;  %v1876_v14 = vpop.eup %1511 }
 0x3eb   : > { %v885_v26 = vsel %vm824_vm2, %v1876_v14, 0.0 }
 0x3ed   : > { %v830_v5 = vpop.xlane.xlu2 %829 }
 0x3ee   : > { %v850_v7 = vsub.f32 %v803_v29, %v830_v5 }
 0x3f0   : > { %v859_v10 = vmul.f32 1.442695, %v850_v7 }
 0x3f2   : > { %1513 = vpow2.f32 %v859_v10  ;;  %880 = vadd.xlane.f32.xlu1 %v879_v11 }
 0x3f3   : > { %1515 = vpow2.f32 %v869_v12 }
 0x3f4   : > { %1517 = vpow2.f32 %v863_v13 }
 0x3f5   : > { %1519 = vpow2.f32 %v867_v27 }
 0x3f6   : > { %1521 = vpow2.f32 %v871_v33  ;;  %v716_v33 = vpop.f32.mrf.mxu3 }
 0x3f8   : > { %v1878_v15 = vpop.eup %1513 }
 0x3f9   : > { %v876_v21 = vsel %vm824_vm2, %v1878_v15, 0.0  ;;  %v1516_v28 = vpop.eup %1515 }
 0x3fa   : > { %877 = vadd.xlane.f32.xlu2 %v876_v21  ;;  %886 = vadd.xlane.f32.xlu1 %v885_v26  ;;  %v1884_v29 = vpop.eup %1517  ;;  %v891_v32 = vsel %vm824_vm2, %v1516_v28, 0.0 }
 0x3fb   : > { %v882_v31 = vsel %vm824_vm2, %v1884_v29, 0.0  ;;  %v1520_v34 = vpop.eup %1519 }
 0x3fc   : > { %v888_v35 = vsel %vm824_vm2, %v1520_v34, 0.0  ;;  %v1522_v36 = vpop.eup %1521 }
 0x3fd   : > { %v894_v38 = vsel %vm824_vm2, %v1522_v36, 0.0 }
 0x402   : > { %883 = vadd.xlane.f32.xlu2 %v882_v31  ;;  %892 = vadd.xlane.f32.xlu1 %v891_v32 }
 0x40a   : > { %889 = vadd.xlane.f32.xlu2 %v888_v35 }
 0x412   : > { %895 = vadd.xlane.f32.xlu2 %v894_v38 }
 0x41b   : > { %660 = vperm.xlu1 %1505, %v644_v37  }
 0x423   : > { %670 = vperm.xlu1 %1505, %v646_v39  }
 0x42a   : > { %665 = vperm.xlu2 %1506, %v645_v40   ;;  %v718_v40 = vpop.f32.mrf.mxu3 }
 0x42b   : > { %972 = vperm.xlu1 %1505, %v958_v41  }
 0x432   : > { %675 = vperm.xlu2 %1506, %v647_v42  }
 0x433   : > { %1000 = vperm.xlu1 %1505, %v986_v43  }
 0x43a   : > { %977 = vperm.xlu2 %1506, %v959_v44  }
 0x43b   : > { %962 = vperm.xlu1 %1505, %v956_v45  }
 0x442   : > { %1005 = vperm.xlu2 %1506, %v987_v46  }
 0x443   : > { %990 = vperm.xlu1 %1505, %v984_v47  }
 0x44a   : > { %967 = vperm.xlu2 %1506, %v957_v48  }
 0x44b   : > { %1028 = vperm.xlu1 %1505, %v1022_v49  }
 0x452   : > { %995 = vperm.xlu2 %1506, %v985_v50  }
 0x453   : > { %1038 = vperm.xlu1 %1505, %v1024_v51  }
 0x45a   : > { %1033 = vperm.xlu2 %1506, %v1023_v52  }
 0x45d   : > { %v875_v54 = vpop.xlane.xlu1 %874 }
 0x462   : > { %1043 = vperm.xlu2 %1506, %v1025_v53  }
 0x465   : > { %v881_v55 = vpop.xlane.xlu1 %880 }
 0x46d   : > { %v878_v56 = vpop.xlane.xlu2 %877  ;;  %v887_v2 = vpop.xlane.xlu1 %886 }
 0x475   : > { %v884_v59 = vpop.xlane.xlu2 %883  ;;  %v893_v5 = vpop.xlane.xlu1 %892 }
 0x476   : > { %1523 = vrcp.f32 %v893_v5 }
 0x47c   : > { %v1524_v8 = vpop.eup %1523 }
 0x47d   : > { %v890_v4 = vpop.xlane.xlu2 %889  ;;  %v911_v10 = vmul.f32 %v1524_v8, %v1516_v28 }
 0x485   : > { %v896_v7 = vpop.xlane.xlu2 %895 }
 0x486   : > { %1525 = vrcp.f32 %v896_v7 }
 0x487   : > { %1527 = vrcp.f32 %v890_v4 }
 0x488   : > { %1529 = vrcp.f32 %v887_v2 }
 0x489   : > { %1531 = vrcp.f32 %v884_v59 }
 0x48a   : > { %1533 = vrcp.f32 %v881_v55 }
 0x48b   : > { %1535 = vrcp.f32 %v878_v56 }
 0x48c   : > { %v1526_v9 = vpop.eup %1525  ;;  %1537 = vrcp.f32 %v875_v54 }
 0x48d   : > { %v912_v11 = vmul.f32 %v1526_v9, %v1522_v36  ;;  %v1528_v12 = vpop.eup %1527  ;;  %v666_v43 = vpop.permute.xlu2 %665 }
 0x48e   : > { %v1530_v20 = vpop.eup %1529  ;;  %v910_v26 = vmul.f32 %v1528_v12, %v1520_v34  ;;  %v661_v44 = vpop.permute.xlu1 %660  ;;  %v719_v45 = vadd.f32 %v718_v40, %v666_v43  ;;  %v1454_v40 = vld [vmem:[%s2076_s2 + $0x24] sm:$0xf]  ;;  %v1395_v43 = vld [vmem:[%s2076_s2 + $0x10] sm:$0xf] }
 0x48f   : > { %v918_v13 = vpack.c.bf16 %v912_v11, %v911_v10  ;;  %v909_v27 = vmul.f32 %v1530_v20, %v1876_v14  ;;  %v1532_v31 = vpop.eup %1531  ;;  %v717_v46 = vadd.f32 %v716_v33, %v661_v44  ;;  %v1411_v20 = vld [vmem:[%s2076_s2 + $0x30] sm:$0xf]  ;;  %v1453_v44 = vld [vmem:[%s2076_s2 + $0x14] sm:$0xf0] }
 0x490   : > { %v1534_v32 = vpop.eup %1533  ;;  %v908_v28 = vmul.f32 %v1532_v31, %v1884_v29 }
 0x491   : > { %v935_v21 = vsel %vm824_vm2, %v918_v13, 0  ;;  %v917_v30 = vpack.c.bf16 %v910_v26, %v909_v27  ;;  %v907_v36 = vmul.f32 %v1534_v32, %v1872_v6  ;;  %v1536_v37 = vpop.eup %1535  ;;  %v721_v6 = vpop.f32.mrf.mxu3  ;;  %v913_v47 = vpack.c.bf16 %v719_v45, %v717_v46  ;;  %v1452_v45 = vld [vmem:[%s2076_s2 + $0x14] sm:$0xf]  ;;  %v1397_v46 = vld [vmem:[%s2076_s2 + $0x18] sm:$0xf0] }
 0x492   : > { %941 = vmatpush.bf16.xpose.msrb.mxu3 %v935_v21  ;;  %v1538_v34 = vpop.eup %1537  ;;  %v906_v14 = vmul.f32 %v1536_v37, %v1878_v15  ;;  %v1416_v21 = vor.u32 %v1456_v60, %v1413_v61  ;;  %v1448_v37 = vld [vmem:[%s2083_s9] sm:$0xff] }
 0x493   : > { %v932_v35 = vsel %vm824_vm2, %v917_v30, 0  ;;  %v916_v38 = vpack.c.bf16 %v908_v28, %v907_v36  ;;  %v905_v41 = vmul.f32 %v1538_v34, %v1868_v58  ;;  %v1449_v34 = vld [vmem:[%s2083_s9 + $0x8] sm:$0xff] }
 0x495   : > { %v929_v39 = vsel %vm824_vm2, %v916_v38, 0  ;;  %v915_v42 = vpack.c.bf16 %v906_v14, %v905_v41  ;;  %v676_v49 = vpop.permute.xlu2 %675  ;;  %v1455_v14 = vld [vmem:[%s2076_s2 + $0x24] sm:$0xf0] }
 0x496   : > { %v671_v50 = vpop.permute.xlu1 %670 }
 0x497   : > { %v926_v29 = vsel %vm824_vm2, %v915_v42, 0  ;;  %v722_v51 = vadd.f32 %v721_v6, %v671_v50  ;;  %v1405_v42 = vld [vmem:[%s2076_s2 + $0x28] sm:$0xf0]  ;;  %v1396_v6 = vor.u32 %v1453_v44, %v1395_v43  ;;  %v1450_v50 = vld [vmem:[%s2076_s2 + $0x4] sm:$0xf] }
 0x499   : > { %v723_v48 = vpop.f32.mrf.mxu3 }
 0x49a   : > { %942 = vmatpush.bf16.xpose.msrb.mxu3 %v932_v35  ;;  %v724_v15 = vadd.f32 %v723_v48, %v676_v49  ;;  %v1387_v48 = vld [vmem:[%s2076_s2] sm:$0xf]  ;;  %v1451_v49 = vld [vmem:[%s2076_s2 + $0x4] sm:$0xf0] }
 0x49c   : > { %v914_v52 = vpack.c.bf16 %v724_v15, %v722_v51  ;;  %v1388_v15 = vor.u32 %v1451_v49, %v1387_v48  ;;  %v1389_v51 = vld [vmem:[%s2076_s2 + $0x8] sm:$0xf0] }
 0x49d   : > { %v978_v58 = vpop.permute.xlu2 %977 }
 0x49e   : > { %v973_v53 = vpop.permute.xlu1 %972 }
 0x4a2   : > { %943 = vmatpush.bf16.xpose.msrb.mxu3 %v929_v39  ;;  %v1403_v39 = vld [vmem:[%s2076_s2 + $0x20] sm:$0xf] }
 0x4a3   : > { %v1404_v41 = vor.u32 %v1455_v14, %v1403_v39 }
 0x4a5   : > { %v1006_v55 = vpop.permute.xlu2 %1005 }
 0x4a6   : > { %v1001_v59 = vpop.permute.xlu1 %1000 }
 0x4aa   : > { %944 = vmatpush.bf16.xpose.msrb.mxu3 %v926_v29  ;;  %v1408_v29 = vor.u32 %v1454_v40, %v1405_v42 }
 0x4ad   : > { %v968_v4 = vpop.permute.xlu2 %967 }
 0x4ae   : > { %v963_v7 = vpop.permute.xlu1 %962 }
 0x4b1   : > { %1373 = vmatmul.msk.bf16.vlgmr.msrb.gmra.mxu3 %vm824_vm2, %v913_v47  ;;  %v1400_v47 = vor.u32 %v1452_v45, %v1397_v46 }
 0x4b2   : > { %1160 = vmatpush.bf16.msra.mxu3 %v1416_v21 }
 0x4b6   : > { %v991_v30 = vpop.permute.xlu1 %990  ;;  %1161 = vmatpush.bf16.msra.mxu3 %v1408_v29 }
 0x4ba   : > { %1162 = vmatpush.bf16.msra.mxu3 %v1400_v47 }
 0x4c1   : > { %1374 = vmatmul.msk.bf16.gmra.mxu3 %vm824_vm2, %v914_v52  ;;  %v1392_v52 = vor.u32 %v1450_v50, %v1389_v51 }
 0x4c3   : > { %1163 = vmatpush.bf16.msra.mxu3 %v1392_v52 }
 0x534   : > { %v946_v54 = vpop.f32.mrf.mxu3 }
 0x535   : > { %v947_v9 = vadd.f32 %v946_v54, %v630_v3  ;;  %v1412_v3 = vor.u32 %v1457_v57, %v1411_v20  ;;  %v1029_v54 = vpop.permute.xlu1 %1028 }
 0x537   : > { %v980_v62 = vmul.f32 %v963_v7, %v947_v9  ;;  %1141 = vmatpush.bf16.msrb.mxu1 %v1412_v3 }
 0x539   : > { %v1008_v31 = vadd.f32 %v991_v30, %v980_v62 }
 0x53b   : > { %v1012_v36 = vmax.f32 %v1008_v31, 0.0  ;;  %1142 = vmatpush.bf16.msrb.mxu1 %v1404_v41 }
 0x53c   : > { %v948_v56 = vpop.f32.mrf.mxu3 }
 0x53d   : > { %v949_v8 = vadd.f32 %v948_v56, %v631_v1  ;;  %v1039_v7 = vpop.permute.xlu1 %1038 }
 0x53f   : > { %v981_v12 = vmul.f32 %v968_v4, %v949_v8  ;;  %1143 = vmatpush.bf16.msrb.mxu1 %v1396_v6 }
 0x543   : > { %1144 = vmatpush.bf16.msrb.mxu1 %v1388_v15 }
 0x544   : > { %v951_v2 = vpop.f32.mrf.mxu3 }
 0x545   : > { %v952_v5 = vadd.f32 %v951_v2, %v632_v63 }
 0x547   : > { %v982_v10 = vmul.f32 %v973_v53, %v952_v5 }
 0x549   : > { %v1010_v63 = vadd.f32 %v1001_v59, %v982_v10 }
 0x54b   : > { %v1014_v32 = vmax.f32 %v1010_v63, 0.0 }
 0x54c   : > { %v953_v11 = vpop.f32.mrf.mxu3 }
 0x54d   : > { %v954_v13 = vadd.f32 %v953_v11, %v633_v0  ;;  %v996_v0 = vpop.permute.xlu2 %995 }
 0x54e   : > { %v1009_v26 = vadd.f32 %v996_v0, %v981_v12 }
 0x54f   : > { %v983_v1 = vmul.f32 %v978_v58, %v954_v13 }
 0x550   : > { %v1013_v35 = vmax.f32 %v1009_v26, 0.0 }
 0x551   : > { %v1011_v27 = vadd.f32 %v1006_v55, %v983_v1 }
 0x552   : > { %v1020_v38 = vpack.c.bf16 %v1013_v35, %v1012_v36 }
 0x553   : > { %v1015_v33 = vmax.f32 %v1011_v27, 0.0 }
 0x555   : > { %v1021_v28 = vpack.c.bf16 %v1015_v33, %v1014_v32  ;;  %v1034_v53 = vpop.permute.xlu2 %1033 }
 0x557   : > { %1068 = vmatpush.bf16.msra.mxu0 %v1021_v28 }
 0x55b   : > { %1069 = vmatpush.bf16.msra.mxu0 %v1020_v38 }
 0x55d   : > { %v1044_v5 = vpop.permute.xlu2 %1043 }
 0x55e   : > { %1383 = vmatmul.msk.bf16.vlgmr.msra.gmra.mxu0 %vm604_vm0, %v1448_v37 }
 0x56e   : > { %1384 = vmatmul.msk.bf16.gmra.mxu0 %vm604_vm0, %v1449_v34 }
 0x5db   : > { %v1071_v58 = vpop.f32.mrf.mxu0 }
 0x5dc   : > { %v1072_v56 = vadd.f32 %v1071_v58, %v1029_v54 }
 0x5e3   : > { %v1073_v55 = vpop.f32.mrf.mxu0 }
 0x5e4   : > { %v1074_v59 = vadd.f32 %v1073_v55, %v1034_v53 }
 0x5e6   : > { %v1081_v2 = vpack.c.bf16 %v1074_v59, %v1072_v56 }
 0x5e8   : > { %1417 = vmatmul.msk.bf16.vlgmr.msrb.gmra.mxu1 %vm824_vm2, %v1081_v2  ;;  %1419 = vmatmul.msk.bf16.vlgmr.msra.gmra.mxu3 %vm824_vm2, %v1081_v2 }
 0x5eb   : > { %v1076_v4 = vpop.f32.mrf.mxu0 }
 0x5ec   : > { %v1077_v9 = vadd.f32 %v1076_v4, %v1039_v7 }
 0x5f3   : > { %v1078_v8 = vpop.f32.mrf.mxu0 }
 0x5f4   : > { %v1079_v10 = vadd.f32 %v1078_v8, %v1044_v5 }
 0x5f6   : > { %v1082_v11 = vpack.c.bf16 %v1079_v10, %v1077_v9 }
 0x5f8   : > { %1418 = vmatmul.msk.bf16.gmra.mxu1 %vm824_vm2, %v1082_v11  ;;  %1420 = vmatmul.msk.bf16.gmra.mxu3 %vm824_vm2, %v1082_v11 }
 0x665   : > { %v1146_v12 = vpop.f32.mrf.mxu1 }
 0x666   : > { %v1147_v13 = vadd.f32 %v1146_v12, %v1767_v16 }
 0x668   : > { %v1175_v20 = vmax.f32 %v1147_v13, 0.0 }
 0x66a   : > { %1183 = vst [vmem:[%s2023_s23] sm:$0xff] %v1175_v20 }
 0x66b   : > { %v1165_v57 = vpop.f32.mrf.mxu3 }
 0x66c   : > { %v1166_v60 = vadd.f32 %v1165_v57, %v1771_v18 }
 0x66d   : > { %v1148_v62 = vpop.f32.mrf.mxu1 }
 0x66e   : > { %v1176_v63 = vmax.f32 %v1166_v60, 0.0  ;;  %v1149_v1 = vadd.f32 %v1148_v62, %v1769_v17 }
 0x670   : > { %1184 = vst [vmem:[%s2023_s23 + $0x8] sm:$0xff] %v1176_v63  ;;  %v1177_v3 = vmax.f32 %v1149_v1, 0.0 }
 0x672   : > { %1185 = vst [vmem:[%s2023_s23 + $0x10] sm:$0xff] %v1177_v3 }
 0x673   : > { %v1167_v16 = vpop.f32.mrf.mxu3 }
 0x674   : > { %v1168_v61 = vadd.f32 %v1167_v16, %v1773_v19 }
 0x675   : > { %v1151_v0 = vpop.f32.mrf.mxu1 }
 0x676   : > { %v1178_v21 = vmax.f32 %v1168_v61, 0.0  ;;  %v1152_v26 = vadd.f32 %v1151_v0, %v1779_v22 }
 0x678   : > { %1186 = vst [vmem:[%s2023_s23 + $0x18] sm:$0xff] %v1178_v21  ;;  %v1179_v18 = vmax.f32 %v1152_v26, 0.0 }
 0x67a   : > { %1187 = vst [vmem:[%s2023_s23 + $0x20] sm:$0xff] %v1179_v18 }
 0x67b   : > { %v1170_v27 = vpop.f32.mrf.mxu3 }
 0x67c   : > { %v1171_v30 = vadd.f32 %v1170_v27, %v1783_v24 }
 0x67d   : > { %v1153_v17 = vpop.f32.mrf.mxu1 }
 0x67e   : > { %v1180_v31 = vmax.f32 %v1171_v30, 0.0  ;;  %v1154_v32 = vadd.f32 %v1153_v17, %v1781_v23 }
 0x680   : > { %1188 = vst [vmem:[%s2023_s23 + $0x28] sm:$0xff] %v1180_v31  ;;  %v1181_v19 = vmax.f32 %v1154_v32, 0.0 }
 0x682   : > { %1189 = vst [vmem:[%s2023_s23 + $0x30] sm:$0xff] %v1181_v19 }
 0x683   : > { %v1172_v22 = vpop.f32.mrf.mxu3 }
 0x684   : > { %v1173_v24 = vadd.f32 %v1172_v22, %v1785_v25 }
 0x686   : > { %v1182_v33 = vmax.f32 %v1173_v24, 0.0 }
 0x688   : > { %1190 = vst [vmem:[%s2023_s23 + $0x38] sm:$0xff] %v1182_v33 }
 0x689   : > { %1566 = shalt.err (!%p1563_p3)
}
 0x68a   : > { %s1604_s29 = smov 256   ;;  %s1605_s23 = smov 16  }
 0x68b   : > { %1461 = dma.vmem_to_hbm [thread:$0]  (%p1704_p5), %s1205_s22, 1024, %s1207_s24, %s1192_s21, %s1604_s29, %s1604_s29, %s1605_s23  }
 0x68c PF: > { %p1467_p4 = scmp.ge.s32.totalorder %s1601_s20, 2  ;;  %s1221_s15 = sand.u32 1, %s1589_s17  }
 0x68d   : > { %s1222_s16 = scalar_lea.sflag [#allocation3], %s1221_s15 }
 0x68e   : > { %p1464_p7 = pnand %p1467_p4, %p1708_p6 }
 0x690   : > { %p1465_p8 = pneg %p1464_p7 }
 0x692   : > { %1584 = dma.done.wait (%p1465_p8), %s1222_s16, 1024  }
 0x693   : > { %1586 = vsyncadd (%p1465_p8), %s1222_s16, 4294966272  ;;  %s2094_s20 = sld [smem:[#allocation6_spill]]  ;;  %s2097_s17 = smov %s1593_s18 }
 0x694   : > { %s2095_s25 = sld [smem:[#allocation5_spill]] }
 0x695   : > { %s2096_s19 = sld [smem:[#allocation7_spill]] }
 0x699   : > { %p21_p9 = scmp.ge.s32.totalorder %s2094_s20, 4  }
 0x69a   : > { %s2098_s18 = smov %s2095_s25 }
 0x69b   :  { %23 = sbr.rel (!%p21_p9) target bundleno = 3 (0x3), region = 99 }
 0x6a0   :  { %1228 = vsyncpa [#allocation3], 1 }
 0x6a1   :  { %1230 = vsyncpa [#allocation3 + $0x1], 1 }

</bundles_post_ra>
